<compile_context>
chip_gen: v7x
topology: tpu7x:2x2x1
jax: 0.10.0
libtpu: 0.0.40
codegen_flags: <defaults>
</compile_context>

<pallas_src>
import jax
import jax.numpy as jnp
from jax.experimental import pallas as pl
from jax.experimental.pallas import tpu as pltpu

LANE = 128  # lane width used to align feature dims


def _round_up(v, m):
    return (v + m - 1) // m * m


def _autoencoder_kernel(x_ref, w1_ref, b1_ref, w2_ref, b2_ref, o_ref):
    # Encoder: x @ W1 + b1, ReLU   (MXU matmul, f32 accumulation)
    h = jnp.dot(x_ref[...], w1_ref[...], preferred_element_type=jnp.float32)
    h = jnp.maximum(h + b1_ref[...], 0.0)

    # Decoder: h @ W2 + b2  (cast h to the weight compute dtype; no-op for f32)
    z = jnp.dot(h.astype(w2_ref.dtype), w2_ref[...],
                preferred_element_type=jnp.float32)
    z = z + b2_ref[...]

    # Exact sigmoid with a single EUP transcendental:
    #   sigmoid(z) = 0.5 * tanh(z / 2) + 0.5
    # (one tanh instead of exp + approx-reciprocal; the fma lands on idle VPU slots).
    o_ref[...] = (0.5 * jnp.tanh(0.5 * z) + 0.5).astype(o_ref.dtype)


def prepare_autoencoder_params(w1, b1, w2, b2, *, compute_dtype=jnp.float32):
    """Pad (and optionally cast) the weights ONCE, outside the per-call hot path.

    w1: (input_dim, hidden_dim)   b1: (hidden_dim,)
    w2: (hidden_dim, input_dim)   b2: (input_dim,)
    (i.e. torch.nn.Linear weights transposed to (in, out)).

    compute_dtype=jnp.bfloat16 is recommended on v6e/v7x (2x MXU throughput, half the
    resident-weight VMEM); accumulation stays f32 and biases stay f32 either way.
    Zero padding is semantics-preserving: padded x columns hit zero W1 rows, padded
    hidden columns give ReLU(0)=0 against zero W2 rows, padded output columns are
    sliced off by the wrapper.
    """
    d_in, hidden = w1.shape
    d_in_pad = _round_up(d_in, LANE)
    h_pad = _round_up(hidden, LANE)
    d_out_pad = _round_up(d_in, LANE)

    w1_p = jnp.pad(w1, ((0, d_in_pad - d_in), (0, h_pad - hidden))).astype(compute_dtype)
    b1_p = jnp.pad(b1, (0, h_pad - hidden)).reshape(1, h_pad).astype(jnp.float32)
    w2_p = jnp.pad(w2, ((0, h_pad - hidden), (0, d_out_pad - d_in))).astype(compute_dtype)
    b2_p = jnp.pad(b2, (0, d_out_pad - d_in)).reshape(1, d_out_pad).astype(jnp.float32)
    return {"w1": w1_p, "b1": b1_p, "w2": w2_p, "b2": b2_p,
            "d_in": d_in, "hidden": hidden}


def _build_call(*, grid, tile_m, d_in_pad, h_pad, d_out_pad, b_pad, vmem_limit,
                single_buffer_weights):
    # Resident (constant index_map) weight blocks: single-buffer when supported.
    w_kw = {"pipeline_mode": pl.Buffered(1)} if single_buffer_weights else {}
    in_specs = [
        pl.BlockSpec((tile_m, d_in_pad), lambda i: (i, 0)),            # x tile
        pl.BlockSpec((d_in_pad, h_pad), lambda i: (0, 0), **w_kw),     # W1 (resident)
        pl.BlockSpec((1, h_pad), lambda i: (0, 0), **w_kw),            # b1
        pl.BlockSpec((h_pad, d_out_pad), lambda i: (0, 0), **w_kw),    # W2 (resident)
        pl.BlockSpec((1, d_out_pad), lambda i: (0, 0), **w_kw),        # b2
    ]
    return pl.pallas_call(
        _autoencoder_kernel,
        out_shape=jax.ShapeDtypeStruct((b_pad, d_out_pad), jnp.float32),
        grid_spec=pltpu.PrefetchScalarGridSpec(
            num_scalar_prefetch=0,
            grid=grid,
            in_specs=in_specs,
            out_specs=pl.BlockSpec((tile_m, d_out_pad), lambda i: (i, 0)),
        ),
        compiler_params=pltpu.CompilerParams(
            dimension_semantics=("parallel",),   # 2-TC sharding on v7x; harmless elsewhere
            vmem_limit_bytes=vmem_limit,
        ),
    )


def autoencoder_forward(x, params, *, tile_m=512):
    """Fused autoencoder forward. x: (batch, input_dim) -> (batch, input_dim) f32.

    tile_m: rows per grid step. 512 is a good default; raise toward 1024 on
    v5e/v6e (128 MiB VMEM) and lower toward 256 (or use bf16 params) on v7x (64 MiB).
    """
    batch, d_in = x.shape
    assert d_in == params["d_in"]
    w1_p, b1_p, w2_p, b2_p = params["w1"], params["b1"], params["w2"], params["b2"]
    d_in_pad, h_pad = w1_p.shape
    d_out_pad = w2_p.shape[1]
    compute_dtype = w1_p.dtype

    # Batch tiling: second-last block dim must be a multiple of 8.
    tile_m = max(8, min(_round_up(tile_m, 8), _round_up(batch, 8)))
    b_pad = _round_up(batch, tile_m)
    grid = (b_pad // tile_m,)

    x_p = x.astype(compute_dtype)
    if b_pad != batch or d_in_pad != d_in:
        x_p = jnp.pad(x_p, ((0, b_pad - batch), (0, d_in_pad - d_in)))

    # Explicit VMEM budget: resident weights (worst case double-buffered if the
    # Buffered(1) path is unavailable) + double-buffered x/out tiles + the hidden
    # intermediate, with 2x headroom, clamped to v7x's 64 MiB physical VMEM.
    wsize = jnp.dtype(compute_dtype).itemsize
    weight_bytes = (d_in_pad * h_pad + h_pad * d_out_pad) * wsize + (h_pad + d_out_pad) * 4
    io_bytes = 2 * tile_m * (d_in_pad * wsize + d_out_pad * 4)
    scratch_bytes = tile_m * h_pad * 4
    vmem_needed = 2 * weight_bytes + io_bytes + scratch_bytes
    vmem_limit = int(min(64 << 20, max(32 << 20, 2 * vmem_needed)))

    call_kwargs = dict(grid=grid, tile_m=tile_m, d_in_pad=d_in_pad, h_pad=h_pad,
                       d_out_pad=d_out_pad, b_pad=b_pad, vmem_limit=vmem_limit)
    args = (x_p, w1_p, b1_p, w2_p, b2_p)
    try:
        out = _build_call(single_buffer_weights=True, **call_kwargs)(*args)
    except Exception:
        # pipeline_mode=pl.Buffered(1) not supported by this jax build; fall back
        # to default double-buffering (correctness identical, 2x weight VMEM).
        out = _build_call(single_buffer_weights=False, **call_kwargs)(*args)

    if b_pad != batch or d_out_pad != d_in:
        out = out[:batch, :d_in]
    return out


if __name__ == "__main__":
    # Small deterministic setup consistent with the module:
    #   input_dim=32, hidden_dim=16, batch=8
    input_dim = 32
    hidden_dim = 16
    batch = 8

    key = jax.random.PRNGKey(0)
    kx, kw1, kb1, kw2, kb2 = jax.random.split(key, 5)

    x = jax.random.normal(kx, (batch, input_dim), dtype=jnp.float32)

    # Weights stored as (in, out), i.e. W^T relative to torch.nn.Linear's (out, in)
    # convention — same math: x @ W^T + b.
    w1 = jax.random.normal(kw1, (input_dim, hidden_dim), dtype=jnp.float32) * (
        1.0 / jnp.sqrt(input_dim)
    )
    b1 = jax.random.normal(kb1, (hidden_dim,), dtype=jnp.float32) * 0.01
    w2 = jax.random.normal(kw2, (hidden_dim, input_dim), dtype=jnp.float32) * (
        1.0 / jnp.sqrt(hidden_dim)
    )
    b2 = jax.random.normal(kb2, (input_dim,), dtype=jnp.float32) * 0.01

    # f32 compute for the correctness check (use compute_dtype=jnp.bfloat16 on
    # v6e/v7x for throughput once validated).
    params = prepare_autoencoder_params(w1, b1, w2, b2, compute_dtype=jnp.float32)

    out = autoencoder_forward(x, params)
    out = jax.block_until_ready(out)

    # Pure-JAX reference of the same forward pass.
    ref = jax.nn.sigmoid(jnp.maximum(x @ w1 + b1, 0.0) @ w2 + b2)

    assert out.shape == (batch, input_dim)
    # The kernel's sigmoid is now exact (tanh form). The remaining tolerance only
    # covers possible MXU f32-matmul pass-count differences between the Pallas
    # matmul and the XLA reference dot (single-pass bf16 vs multi-pass f32),
    # which bound at a few 1e-3 for these magnitudes.
    max_err = float(jnp.max(jnp.abs(out - ref)))
    assert bool(jnp.allclose(out, ref, atol=5e-3, rtol=1e-3)), max_err

    print("KERNEL_OK")
</pallas_src>

<mosaic_0001>
module attributes {stable_mosaic.version = 11 : i64} {
  func.func @_autoencoder_kernel(%arg0: i32, %arg1: memref<8x128xf32, #tpu.memory_space<vmem>>, %arg2: memref<128x128xf32, #tpu.memory_space<vmem>>, %arg3: memref<1x128xf32, #tpu.memory_space<vmem>>, %arg4: memref<128x128xf32, #tpu.memory_space<vmem>>, %arg5: memref<1x128xf32, #tpu.memory_space<vmem>>, %arg6: memref<8x128xf32, #tpu.memory_space<vmem>>) attributes {dimension_semantics = [#tpu.dimension_semantics<parallel>], iteration_bounds = array<i64: 1>, scalar_prefetch = 0 : i64, scratch_operands = 0 : i64, tpu.core_type = #tpu.core_type<tc>, window_params = [{transform_indices = @transform_0, window_bounds = array<i64: 8, 128>}, {pipeline_mode = #tpu.pipeline_mode<synchronous>, transform_indices = @transform_1, window_bounds = array<i64: 128, 128>}, {pipeline_mode = #tpu.pipeline_mode<synchronous>, transform_indices = @transform_2, window_bounds = array<i64: 1, 128>}, {pipeline_mode = #tpu.pipeline_mode<synchronous>, transform_indices = @transform_3, window_bounds = array<i64: 128, 128>}, {pipeline_mode = #tpu.pipeline_mode<synchronous>, transform_indices = @transform_4, window_bounds = array<i64: 1, 128>}, {transform_indices = @transform_5, window_bounds = array<i64: 8, 128>}]} {
    %c0 = arith.constant 0 : index
    %c0_0 = arith.constant 0 : index
    %0 = vector.load %arg1[%c0, %c0_0] : memref<8x128xf32, #tpu.memory_space<vmem>>, vector<8x128xf32>
    %c0_1 = arith.constant 0 : index
    %c0_2 = arith.constant 0 : index
    %1 = vector.load %arg2[%c0_1, %c0_2] : memref<128x128xf32, #tpu.memory_space<vmem>>, vector<128x128xf32>
    %cst = arith.constant dense<0.000000e+00> : vector<8x128xf32>
    %2 = tpu.matmul %0, %1, %cst {dimension_numbers = #tpu.dot_dimension_numbers<[1], [0], [0], [1], [0, 0, 1, 1], [], []>} : vector<8x128xf32>, vector<128x128xf32>, vector<8x128xf32> -> vector<8x128xf32>
    %c0_3 = arith.constant 0 : index
    %c0_4 = arith.constant 0 : index
    %3 = vector.load %arg3[%c0_3, %c0_4] : memref<1x128xf32, #tpu.memory_space<vmem>>, vector<1x128xf32>
    %4 = vector.broadcast %3 : vector<1x128xf32> to vector<8x128xf32>
    %5 = arith.addf %2, %4 : vector<8x128xf32>
    %cst_5 = arith.constant 0.000000e+00 : f32
    %6 = vector.broadcast %cst_5 : f32 to vector<8x128xf32>
    %7 = arith.maximumf %5, %6 : vector<8x128xf32>
    %c0_6 = arith.constant 0 : index
    %c0_7 = arith.constant 0 : index
    %8 = vector.load %arg4[%c0_6, %c0_7] : memref<128x128xf32, #tpu.memory_space<vmem>>, vector<128x128xf32>
    %cst_8 = arith.constant dense<0.000000e+00> : vector<8x128xf32>
    %9 = tpu.matmul %7, %8, %cst_8 {dimension_numbers = #tpu.dot_dimension_numbers<[1], [0], [0], [1], [0, 0, 1, 1], [], []>} : vector<8x128xf32>, vector<128x128xf32>, vector<8x128xf32> -> vector<8x128xf32>
    %c0_9 = arith.constant 0 : index
    %c0_10 = arith.constant 0 : index
    %10 = vector.load %arg5[%c0_9, %c0_10] : memref<1x128xf32, #tpu.memory_space<vmem>>, vector<1x128xf32>
    %11 = vector.broadcast %10 : vector<1x128xf32> to vector<8x128xf32>
    %12 = arith.addf %9, %11 : vector<8x128xf32>
    %cst_11 = arith.constant 5.000000e-01 : f32
    %13 = vector.broadcast %cst_11 : f32 to vector<8x128xf32>
    %14 = arith.mulf %13, %12 : vector<8x128xf32>
    %15 = math.tanh %14 : vector<8x128xf32>
    %cst_12 = arith.constant 5.000000e-01 : f32
    %16 = vector.broadcast %cst_12 : f32 to vector<8x128xf32>
    %17 = arith.mulf %16, %15 : vector<8x128xf32>
    %cst_13 = arith.constant 5.000000e-01 : f32
    %18 = vector.broadcast %cst_13 : f32 to vector<8x128xf32>
    %19 = arith.addf %17, %18 : vector<8x128xf32>
    %c0_14 = arith.constant 0 : index
    %c0_15 = arith.constant 0 : index
    %20 = vector.load %arg6[%c0_14, %c0_15] : memref<8x128xf32, #tpu.memory_space<vmem>>, vector<8x128xf32>
    tpu.vector_store %arg6[%c0_14, %c0_15], %19 {strides = array<i32>} : memref<8x128xf32, #tpu.memory_space<vmem>>, vector<8x128xf32>,
    return
  }
  func.func @transform_0(%arg0: i32) -> (i32, i32) {
    %c0_i32 = arith.constant 0 : i32
    %c0_i32_0 = arith.constant 0 : i32
    return %arg0, %c0_i32 : i32, i32
  }
  func.func @transform_1(%arg0: i32) -> (i32, i32) {
    %c0_i32 = arith.constant 0 : i32
    %c0_i32_0 = arith.constant 0 : i32
    %c0_i32_1 = arith.constant 0 : i32
    return %c0_i32, %c0_i32_0 : i32, i32
  }
  func.func @transform_2(%arg0: i32) -> (i32, i32) {
    %c0_i32 = arith.constant 0 : i32
    %c0_i32_0 = arith.constant 0 : i32
    %c0_i32_1 = arith.constant 0 : i32
    return %c0_i32, %c0_i32_0 : i32, i32
  }
  func.func @transform_3(%arg0: i32) -> (i32, i32) {
    %c0_i32 = arith.constant 0 : i32
    %c0_i32_0 = arith.constant 0 : i32
    %c0_i32_1 = arith.constant 0 : i32
    return %c0_i32, %c0_i32_0 : i32, i32
  }
  func.func @transform_4(%arg0: i32) -> (i32, i32) {
    %c0_i32 = arith.constant 0 : i32
    %c0_i32_0 = arith.constant 0 : i32
    %c0_i32_1 = arith.constant 0 : i32
    return %c0_i32, %c0_i32_0 : i32, i32
  }
  func.func @transform_5(%arg0: i32) -> (i32, i32) {
    %c0_i32 = arith.constant 0 : i32
    %c0_i32_0 = arith.constant 0 : i32
    return %arg0, %c0_i32 : i32, i32
  }
}

module attributes {stable_mosaic.version = 11 : i64} {
  func.func @_autoencoder_kernel(%arg0: i32, %arg1: memref<8x128xf32, #tpu.memory_space<vmem>>, %arg2: memref<128x128xf32, #tpu.memory_space<vmem>>, %arg3: memref<1x128xf32, #tpu.memory_space<vmem>>, %arg4: memref<128x128xf32, #tpu.memory_space<vmem>>, %arg5: memref<1x128xf32, #tpu.memory_space<vmem>>, %arg6: memref<8x128xf32, #tpu.memory_space<vmem>>) attributes {dimension_semantics = [#tpu.dimension_semantics<parallel>], iteration_bounds = array<i64: 1>, scalar_prefetch = 0 : i64, scratch_operands = 0 : i64, tpu.core_type = #tpu.core_type<tc>, window_params = [{transform_indices = @transform_0, window_bounds = array<i64: 8, 128>}, {pipeline_mode = #tpu.pipeline_mode<synchronous>, transform_indices = @transform_1, window_bounds = array<i64: 128, 128>}, {pipeline_mode = #tpu.pipeline_mode<synchronous>, transform_indices = @transform_2, window_bounds = array<i64: 1, 128>}, {pipeline_mode = #tpu.pipeline_mode<synchronous>, transform_indices = @transform_3, window_bounds = array<i64: 128, 128>}, {pipeline_mode = #tpu.pipeline_mode<synchronous>, transform_indices = @transform_4, window_bounds = array<i64: 1, 128>}, {transform_indices = @transform_5, window_bounds = array<i64: 8, 128>}]} {
    %c0 = arith.constant 0 : index
    %c0_0 = arith.constant 0 : index
    %0 = vector.load %arg1[%c0, %c0_0] : memref<8x128xf32, #tpu.memory_space<vmem>>, vector<8x128xf32>
    %c0_1 = arith.constant 0 : index
    %c0_2 = arith.constant 0 : index
    %1 = vector.load %arg2[%c0_1, %c0_2] : memref<128x128xf32, #tpu.memory_space<vmem>>, vector<128x128xf32>
    %cst = arith.constant dense<0.000000e+00> : vector<8x128xf32>
    %2 = tpu.matmul %0, %1, %cst {dimension_numbers = #tpu.dot_dimension_numbers<[1], [0], [0], [1], [0, 0, 1, 1], [], []>} : vector<8x128xf32>, vector<128x128xf32>, vector<8x128xf32> -> vector<8x128xf32>
    %c0_3 = arith.constant 0 : index
    %c0_4 = arith.constant 0 : index
    %3 = vector.load %arg3[%c0_3, %c0_4] : memref<1x128xf32, #tpu.memory_space<vmem>>, vector<1x128xf32>
    %4 = vector.broadcast %3 : vector<1x128xf32> to vector<8x128xf32>
    %5 = arith.addf %2, %4 : vector<8x128xf32>
    %cst_5 = arith.constant 0.000000e+00 : f32
    %6 = vector.broadcast %cst_5 : f32 to vector<8x128xf32>
    %7 = arith.maximumf %5, %6 : vector<8x128xf32>
    %c0_6 = arith.constant 0 : index
    %c0_7 = arith.constant 0 : index
    %8 = vector.load %arg4[%c0_6, %c0_7] : memref<128x128xf32, #tpu.memory_space<vmem>>, vector<128x128xf32>
    %cst_8 = arith.constant dense<0.000000e+00> : vector<8x128xf32>
    %9 = tpu.matmul %7, %8, %cst_8 {dimension_numbers = #tpu.dot_dimension_numbers<[1], [0], [0], [1], [0, 0, 1, 1], [], []>} : vector<8x128xf32>, vector<128x128xf32>, vector<8x128xf32> -> vector<8x128xf32>
    %c0_9 = arith.constant 0 : index
    %c0_10 = arith.constant 0 : index
    %10 = vector.load %arg5[%c0_9, %c0_10] : memref<1x128xf32, #tpu.memory_space<vmem>>, vector<1x128xf32>
    %11 = vector.broadcast %10 : vector<1x128xf32> to vector<8x128xf32>
    %12 = arith.addf %9, %11 : vector<8x128xf32>
    %cst_11 = arith.constant 5.000000e-01 : f32
    %13 = vector.broadcast %cst_11 : f32 to vector<8x128xf32>
    %14 = arith.mulf %13, %12 : vector<8x128xf32>
    %15 = math.tanh %14 : vector<8x128xf32>
    %cst_12 = arith.constant 5.000000e-01 : f32
    %16 = vector.broadcast %cst_12 : f32 to vector<8x128xf32>
    %17 = arith.mulf %16, %15 : vector<8x128xf32>
    %cst_13 = arith.constant 5.000000e-01 : f32
    %18 = vector.broadcast %cst_13 : f32 to vector<8x128xf32>
    %19 = arith.addf %17, %18 : vector<8x128xf32>
    %c0_14 = arith.constant 0 : index
    %c0_15 = arith.constant 0 : index
    %20 = vector.load %arg6[%c0_14, %c0_15] : memref<8x128xf32, #tpu.memory_space<vmem>>, vector<8x128xf32>
    tpu.vector_store %arg6[%c0_14, %c0_15], %19 {strides = array<i32>} : memref<8x128xf32, #tpu.memory_space<vmem>>, vector<8x128xf32>,
    return
  }
  func.func @transform_0(%arg0: i32) -> (i32, i32) {
    %c0_i32 = arith.constant 0 : i32
    %c0_i32_0 = arith.constant 0 : i32
    return %arg0, %c0_i32 : i32, i32
  }
  func.func @transform_1(%arg0: i32) -> (i32, i32) {
    %c0_i32 = arith.constant 0 : i32
    %c0_i32_0 = arith.constant 0 : i32
    %c0_i32_1 = arith.constant 0 : i32
    return %c0_i32, %c0_i32_0 : i32, i32
  }
  func.func @transform_2(%arg0: i32) -> (i32, i32) {
    %c0_i32 = arith.constant 0 : i32
    %c0_i32_0 = arith.constant 0 : i32
    %c0_i32_1 = arith.constant 0 : i32
    return %c0_i32, %c0_i32_0 : i32, i32
  }
  func.func @transform_3(%arg0: i32) -> (i32, i32) {
    %c0_i32 = arith.constant 0 : i32
    %c0_i32_0 = arith.constant 0 : i32
    %c0_i32_1 = arith.constant 0 : i32
    return %c0_i32, %c0_i32_0 : i32, i32
  }
  func.func @transform_4(%arg0: i32) -> (i32, i32) {
    %c0_i32 = arith.constant 0 : i32
    %c0_i32_0 = arith.constant 0 : i32
    %c0_i32_1 = arith.constant 0 : i32
    return %c0_i32, %c0_i32_0 : i32, i32
  }
  func.func @transform_5(%arg0: i32) -> (i32, i32) {
    %c0_i32 = arith.constant 0 : i32
    %c0_i32_0 = arith.constant 0 : i32
    return %arg0, %c0_i32 : i32, i32
  }
}

</mosaic_0001>

<bundles_post_ra>
// kernel: tpu_custom_call.1
= control target key start
LH: loop header
LB: loop body
LE: loop exit
PB: predicated region body
PF: predicated region fallthrough
CT: control target
= control target key end

     0   :  { %10 = vsyncpa [#allocation3], 0  ;;  %s643_s0 = inlined_call_operand.hbm [shape: f32[8,128], index: 0, kind: input, shape index: {}]   ;;  %s644_s1 = inlined_call_operand.hbm [shape: f32[128,128], index: 1, kind: input, shape index: {}]   ;;  %s645_s2 = inlined_call_operand.vmem [shape: f32[1,128], index: 2, kind: input, shape index: {}]   ;;  %s646_s3 = inlined_call_operand.hbm [shape: f32[128,128], index: 3, kind: input, shape index: {}]   ;;  %s647_s4 = inlined_call_operand.vmem [shape: f32[1,128], index: 4, kind: input, shape index: {}]   ;;  %s648_s5 = inlined_call_operand.hbm [shape: f32[8,128], index: 5, kind: output, shape index: {}]  }
   0x1   :  { %11 = vsyncpa [#allocation6], 0 }
   0x2   :  { %12 = vsyncpa [#allocation4], 0  ;;  %s528_s18 = smov [#allocation5]   ;;  %s434_s22 = scalar_lea.hbm %s644_s1, 2048 }
   0x3   :  { %s28_s19 = sshll.u32 %s528_s18, 4  ;;  %p435_p0 = scmp.ne.s32.totalorder %s644_s1, %s434_s22  ;;  %s29_s19 = int_to_ptr.vmem [resolvable:$true] %s28_s19 }
   0x4   :  { %p438_p1 = scmp.lt.u32.totalorder %s434_s22, %s644_s1 }
   0x6   :  { %p440_p2 = pnand %p438_p1, %p435_p0 }
   0x8   :  { %443 = shalt.err (!%p440_p2)
}
   0x9   :  { %s444_s27 = scalar_lea.vmem %s29_s19, 2048  ;;  %p449_p4 = scmp.lt.s32.totalorder %s29_s19, %s29_s19 }
   0xa   :  { %p445_p3 = scmp.ne.s32.totalorder %s29_s19, %s444_s27  ;;  %p450_p5 = scmp.lt.s32.totalorder %s444_s27, %s444_s27 }
   0xc   :  { %p451_p6 = por %p450_p5, %p449_p4 }
   0xe   :  { %p452_p7 = pnand %p451_p6, %p445_p3 }
  0x10   :  { %455 = shalt.err (!%p452_p7)
}
  0x11   :  { %s529_s28 = smov 128   ;;  %s530_s29 = smov 8  }
  0x12   :  { %34 = dma.hbm_to_vmem [thread:$0]  %s644_s1, 2048, %s29_s19, [#allocation6], %s529_s28, %s529_s28, %s530_s29  }
  0x13   :  { %s531_s7 = smov [#allocation2]   ;;  %s532_s9 = smov [#allocation7]  }
  0x14   :  { %s19_s8 = sshll.u32 %s531_s7, 4  ;;  %s42_s10 = sshll.u32 %s532_s9, 4  ;;  %s20_s8 = int_to_ptr.vmem [resolvable:$true] %s19_s8  ;;  %s43_s10 = int_to_ptr.vmem [resolvable:$true] %s42_s10 }
  0x15   :  { %s456_s13 = scalar_lea.hbm %s643_s0, 128 }
  0x16   :  { %p457_p8 = scmp.ne.s32.totalorder %s643_s0, %s456_s13  ;;  %p460_p9 = scmp.lt.u32.totalorder %s456_s13, %s643_s0 }
  0x18   :  { %p462_p10 = pnand %p460_p9, %p457_p8 }
  0x1a   :  { %465 = shalt.err (!%p462_p10)
}
  0x1b   :  { %s466_s1 = scalar_lea.vmem %s20_s8, 128  ;;  %p471_p12 = scmp.lt.s32.totalorder %s20_s8, %s20_s8 }
  0x1c   :  { %p467_p11 = scmp.ne.s32.totalorder %s20_s8, %s466_s1  ;;  %p472_p13 = scmp.lt.s32.totalorder %s466_s1, %s466_s1 }
  0x1e   :  { %p473_p0 = por %p472_p13, %p471_p12 }
  0x20   :  { %p474_p1 = pnand %p473_p0, %p467_p11 }
  0x22   :  { %477 = shalt.err (!%p474_p1)
}
  0x23   :  { %22 = dma.hbm_to_vmem [thread:$0]  %s643_s0, 128, %s20_s8, [#allocation3]  }
  0x24   :  { %s478_s22 = scalar_lea.hbm %s646_s3, 2048 }
  0x25   :  { %p479_p2 = scmp.ne.s32.totalorder %s646_s3, %s478_s22  ;;  %p482_p3 = scmp.lt.u32.totalorder %s478_s22, %s646_s3 }
  0x27   :  { %p484_p4 = pnand %p482_p3, %p479_p2 }
  0x29   :  { %487 = shalt.err (!%p484_p4)
}
  0x2a   :  { %s488_s27 = scalar_lea.vmem %s43_s10, 2048  ;;  %p493_p6 = scmp.lt.s32.totalorder %s43_s10, %s43_s10 }
  0x2b   :  { %p489_p5 = scmp.ne.s32.totalorder %s43_s10, %s488_s27  ;;  %p494_p7 = scmp.lt.s32.totalorder %s488_s27, %s488_s27 }
  0x2d   :  { %p495_p8 = por %p494_p7, %p493_p6 }
  0x2f   :  { %p496_p9 = pnand %p495_p8, %p489_p5 }
  0x31   :  { %499 = shalt.err (!%p496_p9)
}
  0x32   :  { %48 = dma.hbm_to_vmem [thread:$0]  %s646_s3, 2048, %s43_s10, [#allocation6], %s529_s28, %s529_s28, %s530_s29  }
  0x33   :  { %522 = dma.done.wait [#allocation3], 128  }
  0x34   :  { %523 = vsyncadd [#allocation3], 4294967168 }
  0x35   :  { %524 = dma.done.wait [#allocation6], 4096  }
  0x36   :  { %525 = vsyncadd [#allocation6], 4294963200  ;;  %v533_v0 = vmov 0.0|0.0   ;;  %vm534_vm0 = vmmov 0   ;;  %v535_v1 = vmov 0.0   ;;  %v61_v2 = vld [vmem:[#allocation5] sm:$0xff] }
  0x37   :  { %375 = vmatprep.subr.bf16.mxu0 %v533_v0  ;;  %337 = vmatprep.mubr.msk.f32.mxu0 %vm534_vm0, %v535_v1  ;;  %v62_v3 = vld [vmem:[#allocation5 + $0x8] sm:$0xff]  ;;  %v63_v4 = vld [vmem:[#allocation5 + $0x10] sm:$0xff]  ;;  %v64_v6 = vld [vmem:[#allocation5 + $0x18] sm:$0xff]  ;;  %s536_s7 = smov [#allocation8]  }
  0x38   :  { %399 = vmatprep.subr.bf16.mxu1 %v533_v0  ;;  %372 = vmatprep.mubr.msk.f32.mxu1 %vm534_vm0, %v535_v1  ;;  %v376_v5 = vpack.c.bf16 %v62_v3, %v61_v2  ;;  %v379_v7 = vpack.c.bf16 %v64_v6, %v63_v4  ;;  %v65_v8 = vld [vmem:[#allocation5 + $0x20] sm:$0xff]  ;;  %v66_v9 = vld [vmem:[#allocation5 + $0x28] sm:$0xff]  ;;  %v157_v12 = vld [vmem:[#allocation7 + $0x10] sm:$0xff]  ;;  %s259_s8 = sshll.u32 %s536_s7, 4  ;;  %s260_s8 = int_to_ptr.vmem [resolvable:$true] %s259_s8 }
  0x39   :  { %v155_v10 = vld [vmem:[#allocation7] sm:$0xff]  ;;  %v156_v11 = vld [vmem:[#allocation7 + $0x8] sm:$0xff]  ;;  %v158_v13 = vld [vmem:[#allocation7 + $0x18] sm:$0xff]  ;;  %v382_v14 = vpack.c.bf16 %v66_v9, %v65_v8  ;;  %p505_p11 = scmp.lt.s32.totalorder %s260_s8, %s260_s8 }
  0x3a   :  { %377 = vmatpush3.bf16.msra.mxu0 %v376_v5  ;;  %v400_v15 = vpack.c.bf16 %v156_v11, %v155_v10  ;;  %v67_v16 = vld [vmem:[#allocation5 + $0x30] sm:$0xff]  ;;  %v68_v17 = vld [vmem:[#allocation5 + $0x38] sm:$0xff]  ;;  %v403_v18 = vpack.c.bf16 %v158_v13, %v157_v12  ;;  %v159_v19 = vld [vmem:[#allocation7 + $0x20] sm:$0xff] }
  0x3b   :  { %378 = vmatprep.subr.bf16.mxu0 %v533_v0  ;;  %v160_v20 = vld [vmem:[#allocation7 + $0x28] sm:$0xff]  ;;  %v385_v21 = vpack.c.bf16 %v68_v17, %v67_v16  ;;  %v69_v22 = vld [vmem:[#allocation5 + $0x40] sm:$0xff]  ;;  %v161_v25 = vld [vmem:[#allocation7 + $0x30] sm:$0xff] }
  0x3c   :  { %401 = vmatpush3.bf16.msra.mxu1 %v400_v15  ;;  %v70_v23 = vld [vmem:[#allocation5 + $0x48] sm:$0xff]  ;;  %v406_v24 = vpack.c.bf16 %v160_v20, %v159_v19  ;;  %v162_v26 = vld [vmem:[#allocation7 + $0x38] sm:$0xff]  ;;  %v71_v28 = vld [vmem:[#allocation5 + $0x50] sm:$0xff] }
  0x3d   :  { %402 = vmatprep.subr.bf16.mxu1 %v533_v0  ;;  %v388_v27 = vpack.c.bf16 %v70_v23, %v69_v22  ;;  %v72_v29 = vld [vmem:[#allocation5 + $0x58] sm:$0xff]  ;;  %v409_v30 = vpack.c.bf16 %v162_v26, %v161_v25  ;;  %v163_v31 = vld [vmem:[#allocation7 + $0x40] sm:$0xff]  ;;  %v164_v32 = vld [vmem:[#allocation7 + $0x48] sm:$0xff] }
  0x3e   :  { %380 = vmatpush3.bf16.msra.mxu0 %v379_v7  ;;  %v391_v33 = vpack.c.bf16 %v72_v29, %v71_v28  ;;  %v73_v34 = vld [vmem:[#allocation5 + $0x60] sm:$0xff]  ;;  %v74_v35 = vld [vmem:[#allocation5 + $0x68] sm:$0xff]  ;;  %v412_v36 = vpack.c.bf16 %v164_v32, %v163_v31  ;;  %v165_v37 = vld [vmem:[#allocation7 + $0x50] sm:$0xff] }
  0x3f   :  { %381 = vmatprep.subr.bf16.mxu0 %v533_v0  ;;  %v166_v38 = vld [vmem:[#allocation7 + $0x58] sm:$0xff]  ;;  %v394_v39 = vpack.c.bf16 %v74_v35, %v73_v34  ;;  %v75_v40 = vld [vmem:[#allocation5 + $0x70] sm:$0xff]  ;;  %v167_v43 = vld [vmem:[#allocation7 + $0x60] sm:$0xff] }
  0x40   :  { %404 = vmatpush3.bf16.msra.mxu1 %v403_v18  ;;  %v76_v41 = vld [vmem:[#allocation5 + $0x78] sm:$0xff]  ;;  %v415_v42 = vpack.c.bf16 %v166_v38, %v165_v37  ;;  %v168_v44 = vld [vmem:[#allocation7 + $0x68] sm:$0xff]  ;;  %v169_v48 = vld [vmem:[#allocation7 + $0x70] sm:$0xff] }
  0x41   :  { %405 = vmatprep.subr.bf16.mxu1 %v533_v0  ;;  %v397_v45 = vpack.c.bf16 %v76_v41, %v75_v40  ;;  %v418_v46 = vpack.c.bf16 %v168_v44, %v167_v43  ;;  %v60_v47 = vld [vmem:[#allocation2] sm:$0xff] }
  0x42   :  { %383 = vmatpush3.bf16.msra.mxu0 %v382_v14  ;;  %v170_v49 = vld [vmem:[#allocation7 + $0x78] sm:$0xff] }
  0x43   :  { %384 = vmatprep.subr.bf16.mxu0 %v533_v0  ;;  %v421_v50 = vpack.c.bf16 %v170_v49, %v169_v48  ;;  %v269_v51 = vld [vmem:[%s645_s2] ss:$0 sm:$0xff]  ;;  %s500_s2 = scalar_lea.vmem %s260_s8, 128 }
  0x44   :  { %407 = vmatpush3.bf16.msra.mxu1 %v406_v24  ;;  %v270_v56 = vld [vmem:[%s647_s4] ss:$0 sm:$0xff]  ;;  %p501_p10 = scmp.ne.s32.totalorder %s260_s8, %s500_s2  ;;  %p506_p12 = scmp.lt.s32.totalorder %s500_s2, %s500_s2 }
  0x45   :  { %408 = vmatprep.subr.bf16.mxu1 %v533_v0 }
  0x46   :  { %386 = vmatpush3.bf16.msra.mxu0 %v385_v21  ;;  %p507_p13 = por %p506_p12, %p505_p11 }
  0x47   :  { %387 = vmatprep.subr.bf16.mxu0 %v533_v0 }
  0x48   :  { %410 = vmatpush3.bf16.msra.mxu1 %v409_v30  ;;  %p508_p0 = pnand %p507_p13, %p501_p10 }
  0x49   :  { %411 = vmatprep.subr.bf16.mxu1 %v533_v0 }
  0x4a   :  { %389 = vmatpush3.bf16.msra.mxu0 %v388_v27 }
  0x4b   :  { %390 = vmatprep.subr.bf16.mxu0 %v533_v0 }
  0x4c   :  { %413 = vmatpush3.bf16.msra.mxu1 %v412_v36 }
  0x4d   :  { %414 = vmatprep.subr.bf16.mxu1 %v533_v0 }
  0x4e   :  { %392 = vmatpush3.bf16.msra.mxu0 %v391_v33 }
  0x4f   :  { %393 = vmatprep.subr.bf16.mxu0 %v533_v0 }
  0x50   :  { %416 = vmatpush3.bf16.msra.mxu1 %v415_v42 }
  0x51   :  { %417 = vmatprep.subr.bf16.mxu1 %v533_v0 }
  0x52   :  { %395 = vmatpush3.bf16.msra.mxu0 %v394_v39 }
  0x53   :  { %396 = vmatprep.subr.bf16.mxu0 %v533_v0 }
  0x54   :  { %419 = vmatpush3.bf16.msra.mxu1 %v418_v46 }
  0x55   :  { %420 = vmatprep.subr.bf16.mxu1 %v533_v0 }
  0x56   :  { %398 = vmatpush3.bf16.msra.mxu0 %v397_v45 }
  0x58   :  { %422 = vmatpush3.bf16.msra.mxu1 %v421_v50 }
  0x59   :  { %338 = vmatmul.mubr.f32.vlgmr.msra.gmra.mrb[0].mxu0 %v60_v47 }
 0x12c   :  { %v150_v52 = vpop.f32.mrb[0].mxu0 }
 0x12d   :  { %v151_v53 = vadd.f32 %v269_v51, %v150_v52  ;;  %v339_v54 = vpop.f32.mrb[1].mxu0 }
 0x12f   :  { %v154_v55 = vmax.f32 %v151_v53, 0.0 }
 0x131   :  { %373 = vmatmul.mubr.f32.vlgmr.msra.gmra.mrb[0].mxu1 %v154_v55 }
 0x204   :  { %v244_v57 = vpop.f32.mrb[0].mxu1 }
 0x205   :  { %v245_v58 = vadd.f32 %v270_v56, %v244_v57  ;;  %v374_v59 = vpop.f32.mrb[1].mxu1 }
 0x207   :  { %v248_v60 = vmul.f32 0.5, %v245_v58 }
 0x209   :  { %432 = vtanh.f32 %v248_v60 }
 0x213   :  { %v433_v61 = vpop.eup %432 }
 0x214   :  { %v250_v62 = vmul.f32 0.5, %v433_v61 }
 0x216   :  { %v251_v63 = vadd.f32 0.5, %v250_v62 }
 0x218   :  { %252 = vst [vmem:[#allocation8] sm:$0xff] %v251_v63 }
 0x219   :  { %511 = shalt.err (!%p508_p0)
}
 0x21a   :  { %s512_s10 = scalar_lea.hbm %s648_s5, 128 }
 0x21b   :  { %p513_p1 = scmp.ne.s32.totalorder %s648_s5, %s512_s10  ;;  %p516_p2 = scmp.lt.u32.totalorder %s512_s10, %s648_s5 }
 0x21d   :  { %p518_p3 = pnand %p516_p2, %p513_p1 }
 0x21f   :  { %521 = shalt.err (!%p518_p3)
}
 0x220   :  { %262 = dma.vmem_to_hbm [thread:$0]  %s260_s8, 128, %s648_s5, [#allocation4]  }
 0x221   :  { %526 = dma.done.wait [#allocation4], 128  }
 0x222   :  { %527 = vsyncadd [#allocation4], 4294967168 }
 0x223   :  { %266 = vsyncpa [#allocation3], 1 }
 0x224   :  { %267 = vsyncpa [#allocation6], 1 }
 0x225   :  { %268 = vsyncpa [#allocation4], 1 }

// kernel: tpu_custom_call.1
= control target key start
LH: loop header
LB: loop body
LE: loop exit
PB: predicated region body
PF: predicated region fallthrough
CT: control target
= control target key end

     0   :  { %10 = vsyncpa [#allocation3], 0  ;;  %s643_s0 = inlined_call_operand.hbm [shape: f32[8,128], index: 0, kind: input, shape index: {}]   ;;  %s644_s1 = inlined_call_operand.hbm [shape: f32[128,128], index: 1, kind: input, shape index: {}]   ;;  %s645_s2 = inlined_call_operand.vmem [shape: f32[1,128], index: 2, kind: input, shape index: {}]   ;;  %s646_s3 = inlined_call_operand.hbm [shape: f32[128,128], index: 3, kind: input, shape index: {}]   ;;  %s647_s4 = inlined_call_operand.vmem [shape: f32[1,128], index: 4, kind: input, shape index: {}]   ;;  %s648_s5 = inlined_call_operand.hbm [shape: f32[8,128], index: 5, kind: output, shape index: {}]  }
   0x1   :  { %11 = vsyncpa [#allocation6], 0 }
   0x2   :  { %12 = vsyncpa [#allocation4], 0  ;;  %s528_s18 = smov [#allocation5]   ;;  %s434_s22 = scalar_lea.hbm %s644_s1, 2048 }
   0x3   :  { %s28_s19 = sshll.u32 %s528_s18, 4  ;;  %p435_p0 = scmp.ne.s32.totalorder %s644_s1, %s434_s22  ;;  %s29_s19 = int_to_ptr.vmem [resolvable:$true] %s28_s19 }
   0x4   :  { %p438_p1 = scmp.lt.u32.totalorder %s434_s22, %s644_s1 }
   0x6   :  { %p440_p2 = pnand %p438_p1, %p435_p0 }
   0x8   :  { %443 = shalt.err (!%p440_p2)
}
   0x9   :  { %s444_s27 = scalar_lea.vmem %s29_s19, 2048  ;;  %p449_p4 = scmp.lt.s32.totalorder %s29_s19, %s29_s19 }
   0xa   :  { %p445_p3 = scmp.ne.s32.totalorder %s29_s19, %s444_s27  ;;  %p450_p5 = scmp.lt.s32.totalorder %s444_s27, %s444_s27 }
   0xc   :  { %p451_p6 = por %p450_p5, %p449_p4 }
   0xe   :  { %p452_p7 = pnand %p451_p6, %p445_p3 }
  0x10   :  { %455 = shalt.err (!%p452_p7)
}
  0x11   :  { %s529_s28 = smov 128   ;;  %s530_s29 = smov 8  }
  0x12   :  { %34 = dma.hbm_to_vmem [thread:$0]  %s644_s1, 2048, %s29_s19, [#allocation6], %s529_s28, %s529_s28, %s530_s29  }
  0x13   :  { %s531_s7 = smov [#allocation2]   ;;  %s532_s9 = smov [#allocation7]  }
  0x14   :  { %s19_s8 = sshll.u32 %s531_s7, 4  ;;  %s42_s10 = sshll.u32 %s532_s9, 4  ;;  %s20_s8 = int_to_ptr.vmem [resolvable:$true] %s19_s8  ;;  %s43_s10 = int_to_ptr.vmem [resolvable:$true] %s42_s10 }
  0x15   :  { %s456_s13 = scalar_lea.hbm %s643_s0, 128 }
  0x16   :  { %p457_p8 = scmp.ne.s32.totalorder %s643_s0, %s456_s13  ;;  %p460_p9 = scmp.lt.u32.totalorder %s456_s13, %s643_s0 }
  0x18   :  { %p462_p10 = pnand %p460_p9, %p457_p8 }
  0x1a   :  { %465 = shalt.err (!%p462_p10)
}
  0x1b   :  { %s466_s1 = scalar_lea.vmem %s20_s8, 128  ;;  %p471_p12 = scmp.lt.s32.totalorder %s20_s8, %s20_s8 }
  0x1c   :  { %p467_p11 = scmp.ne.s32.totalorder %s20_s8, %s466_s1  ;;  %p472_p13 = scmp.lt.s32.totalorder %s466_s1, %s466_s1 }
  0x1e   :  { %p473_p0 = por %p472_p13, %p471_p12 }
  0x20   :  { %p474_p1 = pnand %p473_p0, %p467_p11 }
  0x22   :  { %477 = shalt.err (!%p474_p1)
}
  0x23   :  { %22 = dma.hbm_to_vmem [thread:$0]  %s643_s0, 128, %s20_s8, [#allocation3]  }
  0x24   :  { %s478_s22 = scalar_lea.hbm %s646_s3, 2048 }
  0x25   :  { %p479_p2 = scmp.ne.s32.totalorder %s646_s3, %s478_s22  ;;  %p482_p3 = scmp.lt.u32.totalorder %s478_s22, %s646_s3 }
  0x27   :  { %p484_p4 = pnand %p482_p3, %p479_p2 }
  0x29   :  { %487 = shalt.err (!%p484_p4)
}
  0x2a   :  { %s488_s27 = scalar_lea.vmem %s43_s10, 2048  ;;  %p493_p6 = scmp.lt.s32.totalorder %s43_s10, %s43_s10 }
  0x2b   :  { %p489_p5 = scmp.ne.s32.totalorder %s43_s10, %s488_s27  ;;  %p494_p7 = scmp.lt.s32.totalorder %s488_s27, %s488_s27 }
  0x2d   :  { %p495_p8 = por %p494_p7, %p493_p6 }
  0x2f   :  { %p496_p9 = pnand %p495_p8, %p489_p5 }
  0x31   :  { %499 = shalt.err (!%p496_p9)
}
  0x32   :  { %48 = dma.hbm_to_vmem [thread:$0]  %s646_s3, 2048, %s43_s10, [#allocation6], %s529_s28, %s529_s28, %s530_s29  }
  0x33   :  { %522 = dma.done.wait [#allocation3], 128  }
  0x34   :  { %523 = vsyncadd [#allocation3], 4294967168 }
  0x35   :  { %524 = dma.done.wait [#allocation6], 4096  }
  0x36   :  { %525 = vsyncadd [#allocation6], 4294963200  ;;  %v533_v0 = vmov 0.0|0.0   ;;  %vm534_vm0 = vmmov 0   ;;  %v535_v1 = vmov 0.0   ;;  %v61_v2 = vld [vmem:[#allocation5] sm:$0xff] }
  0x37   :  { %375 = vmatprep.subr.bf16.mxu0 %v533_v0  ;;  %337 = vmatprep.mubr.msk.f32.mxu0 %vm534_vm0, %v535_v1  ;;  %v62_v3 = vld [vmem:[#allocation5 + $0x8] sm:$0xff]  ;;  %v63_v4 = vld [vmem:[#allocation5 + $0x10] sm:$0xff]  ;;  %v64_v6 = vld [vmem:[#allocation5 + $0x18] sm:$0xff]  ;;  %s536_s7 = smov [#allocation8]  }
  0x38   :  { %399 = vmatprep.subr.bf16.mxu1 %v533_v0  ;;  %372 = vmatprep.mubr.msk.f32.mxu1 %vm534_vm0, %v535_v1  ;;  %v376_v5 = vpack.c.bf16 %v62_v3, %v61_v2  ;;  %v379_v7 = vpack.c.bf16 %v64_v6, %v63_v4  ;;  %v65_v8 = vld [vmem:[#allocation5 + $0x20] sm:$0xff]  ;;  %v66_v9 = vld [vmem:[#allocation5 + $0x28] sm:$0xff]  ;;  %v157_v12 = vld [vmem:[#allocation7 + $0x10] sm:$0xff]  ;;  %s259_s8 = sshll.u32 %s536_s7, 4  ;;  %s260_s8 = int_to_ptr.vmem [resolvable:$true] %s259_s8 }
  0x39   :  { %v155_v10 = vld [vmem:[#allocation7] sm:$0xff]  ;;  %v156_v11 = vld [vmem:[#allocation7 + $0x8] sm:$0xff]  ;;  %v158_v13 = vld [vmem:[#allocation7 + $0x18] sm:$0xff]  ;;  %v382_v14 = vpack.c.bf16 %v66_v9, %v65_v8  ;;  %p505_p11 = scmp.lt.s32.totalorder %s260_s8, %s260_s8 }
  0x3a   :  { %377 = vmatpush3.bf16.msra.mxu0 %v376_v5  ;;  %v400_v15 = vpack.c.bf16 %v156_v11, %v155_v10  ;;  %v67_v16 = vld [vmem:[#allocation5 + $0x30] sm:$0xff]  ;;  %v68_v17 = vld [vmem:[#allocation5 + $0x38] sm:$0xff]  ;;  %v403_v18 = vpack.c.bf16 %v158_v13, %v157_v12  ;;  %v159_v19 = vld [vmem:[#allocation7 + $0x20] sm:$0xff] }
  0x3b   :  { %378 = vmatprep.subr.bf16.mxu0 %v533_v0  ;;  %v160_v20 = vld [vmem:[#allocation7 + $0x28] sm:$0xff]  ;;  %v385_v21 = vpack.c.bf16 %v68_v17, %v67_v16  ;;  %v69_v22 = vld [vmem:[#allocation5 + $0x40] sm:$0xff]  ;;  %v161_v25 = vld [vmem:[#allocation7 + $0x30] sm:$0xff] }
  0x3c   :  { %401 = vmatpush3.bf16.msra.mxu1 %v400_v15  ;;  %v70_v23 = vld [vmem:[#allocation5 + $0x48] sm:$0xff]  ;;  %v406_v24 = vpack.c.bf16 %v160_v20, %v159_v19  ;;  %v162_v26 = vld [vmem:[#allocation7 + $0x38] sm:$0xff]  ;;  %v71_v28 = vld [vmem:[#allocation5 + $0x50] sm:$0xff] }
  0x3d   :  { %402 = vmatprep.subr.bf16.mxu1 %v533_v0  ;;  %v388_v27 = vpack.c.bf16 %v70_v23, %v69_v22  ;;  %v72_v29 = vld [vmem:[#allocation5 + $0x58] sm:$0xff]  ;;  %v409_v30 = vpack.c.bf16 %v162_v26, %v161_v25  ;;  %v163_v31 = vld [vmem:[#allocation7 + $0x40] sm:$0xff]  ;;  %v164_v32 = vld [vmem:[#allocation7 + $0x48] sm:$0xff] }
  0x3e   :  { %380 = vmatpush3.bf16.msra.mxu0 %v379_v7  ;;  %v391_v33 = vpack.c.bf16 %v72_v29, %v71_v28  ;;  %v73_v34 = vld [vmem:[#allocation5 + $0x60] sm:$0xff]  ;;  %v74_v35 = vld [vmem:[#allocation5 + $0x68] sm:$0xff]  ;;  %v412_v36 = vpack.c.bf16 %v164_v32, %v163_v31  ;;  %v165_v37 = vld [vmem:[#allocation7 + $0x50] sm:$0xff] }
  0x3f   :  { %381 = vmatprep.subr.bf16.mxu0 %v533_v0  ;;  %v166_v38 = vld [vmem:[#allocation7 + $0x58] sm:$0xff]  ;;  %v394_v39 = vpack.c.bf16 %v74_v35, %v73_v34  ;;  %v75_v40 = vld [vmem:[#allocation5 + $0x70] sm:$0xff]  ;;  %v167_v43 = vld [vmem:[#allocation7 + $0x60] sm:$0xff] }
  0x40   :  { %404 = vmatpush3.bf16.msra.mxu1 %v403_v18  ;;  %v76_v41 = vld [vmem:[#allocation5 + $0x78] sm:$0xff]  ;;  %v415_v42 = vpack.c.bf16 %v166_v38, %v165_v37  ;;  %v168_v44 = vld [vmem:[#allocation7 + $0x68] sm:$0xff]  ;;  %v169_v48 = vld [vmem:[#allocation7 + $0x70] sm:$0xff] }
  0x41   :  { %405 = vmatprep.subr.bf16.mxu1 %v533_v0  ;;  %v397_v45 = vpack.c.bf16 %v76_v41, %v75_v40  ;;  %v418_v46 = vpack.c.bf16 %v168_v44, %v167_v43  ;;  %v60_v47 = vld [vmem:[#allocation2] sm:$0xff] }
  0x42   :  { %383 = vmatpush3.bf16.msra.mxu0 %v382_v14  ;;  %v170_v49 = vld [vmem:[#allocation7 + $0x78] sm:$0xff] }
  0x43   :  { %384 = vmatprep.subr.bf16.mxu0 %v533_v0  ;;  %v421_v50 = vpack.c.bf16 %v170_v49, %v169_v48  ;;  %v269_v51 = vld [vmem:[%s645_s2] ss:$0 sm:$0xff]  ;;  %s500_s2 = scalar_lea.vmem %s260_s8, 128 }
  0x44   :  { %407 = vmatpush3.bf16.msra.mxu1 %v406_v24  ;;  %v270_v56 = vld [vmem:[%s647_s4] ss:$0 sm:$0xff]  ;;  %p501_p10 = scmp.ne.s32.totalorder %s260_s8, %s500_s2  ;;  %p506_p12 = scmp.lt.s32.totalorder %s500_s2, %s500_s2 }
  0x45   :  { %408 = vmatprep.subr.bf16.mxu1 %v533_v0 }
  0x46   :  { %386 = vmatpush3.bf16.msra.mxu0 %v385_v21  ;;  %p507_p13 = por %p506_p12, %p505_p11 }
  0x47   :  { %387 = vmatprep.subr.bf16.mxu0 %v533_v0 }
  0x48   :  { %410 = vmatpush3.bf16.msra.mxu1 %v409_v30  ;;  %p508_p0 = pnand %p507_p13, %p501_p10 }
  0x49   :  { %411 = vmatprep.subr.bf16.mxu1 %v533_v0 }
  0x4a   :  { %389 = vmatpush3.bf16.msra.mxu0 %v388_v27 }
  0x4b   :  { %390 = vmatprep.subr.bf16.mxu0 %v533_v0 }
  0x4c   :  { %413 = vmatpush3.bf16.msra.mxu1 %v412_v36 }
  0x4d   :  { %414 = vmatprep.subr.bf16.mxu1 %v533_v0 }
  0x4e   :  { %392 = vmatpush3.bf16.msra.mxu0 %v391_v33 }
  0x4f   :  { %393 = vmatprep.subr.bf16.mxu0 %v533_v0 }
  0x50   :  { %416 = vmatpush3.bf16.msra.mxu1 %v415_v42 }
  0x51   :  { %417 = vmatprep.subr.bf16.mxu1 %v533_v0 }
  0x52   :  { %395 = vmatpush3.bf16.msra.mxu0 %v394_v39 }
  0x53   :  { %396 = vmatprep.subr.bf16.mxu0 %v533_v0 }
  0x54   :  { %419 = vmatpush3.bf16.msra.mxu1 %v418_v46 }
  0x55   :  { %420 = vmatprep.subr.bf16.mxu1 %v533_v0 }
  0x56   :  { %398 = vmatpush3.bf16.msra.mxu0 %v397_v45 }
  0x58   :  { %422 = vmatpush3.bf16.msra.mxu1 %v421_v50 }
  0x59   :  { %338 = vmatmul.mubr.f32.vlgmr.msra.gmra.mrb[0].mxu0 %v60_v47 }
 0x12c   :  { %v150_v52 = vpop.f32.mrb[0].mxu0 }
 0x12d   :  { %v151_v53 = vadd.f32 %v269_v51, %v150_v52  ;;  %v339_v54 = vpop.f32.mrb[1].mxu0 }
 0x12f   :  { %v154_v55 = vmax.f32 %v151_v53, 0.0 }
 0x131   :  { %373 = vmatmul.mubr.f32.vlgmr.msra.gmra.mrb[0].mxu1 %v154_v55 }
 0x204   :  { %v244_v57 = vpop.f32.mrb[0].mxu1 }
 0x205   :  { %v245_v58 = vadd.f32 %v270_v56, %v244_v57  ;;  %v374_v59 = vpop.f32.mrb[1].mxu1 }
 0x207   :  { %v248_v60 = vmul.f32 0.5, %v245_v58 }
 0x209   :  { %432 = vtanh.f32 %v248_v60 }
 0x213   :  { %v433_v61 = vpop.eup %432 }
 0x214   :  { %v250_v62 = vmul.f32 0.5, %v433_v61 }
 0x216   :  { %v251_v63 = vadd.f32 0.5, %v250_v62 }
 0x218   :  { %252 = vst [vmem:[#allocation8] sm:$0xff] %v251_v63 }
 0x219   :  { %511 = shalt.err (!%p508_p0)
}
 0x21a   :  { %s512_s10 = scalar_lea.hbm %s648_s5, 128 }
 0x21b   :  { %p513_p1 = scmp.ne.s32.totalorder %s648_s5, %s512_s10  ;;  %p516_p2 = scmp.lt.u32.totalorder %s512_s10, %s648_s5 }
 0x21d   :  { %p518_p3 = pnand %p516_p2, %p513_p1 }
 0x21f   :  { %521 = shalt.err (!%p518_p3)
}
 0x220   :  { %262 = dma.vmem_to_hbm [thread:$0]  %s260_s8, 128, %s648_s5, [#allocation4]  }
 0x221   :  { %526 = dma.done.wait [#allocation4], 128  }
 0x222   :  { %527 = vsyncadd [#allocation4], 4294967168 }
 0x223   :  { %266 = vsyncpa [#allocation3], 1 }
 0x224   :  { %267 = vsyncpa [#allocation6], 1 }
 0x225   :  { %268 = vsyncpa [#allocation4], 1 }

</bundles_post_ra>
